<compile_context>
chip_gen: v7x
topology: tpu7x:2x2x1
jax: 0.10.0
libtpu: 0.0.40
codegen_flags: <defaults>
</compile_context>

<pallas_src>
import math

import jax
import jax.numpy as jnp
from jax import lax
from jax.experimental import pallas as pl
from jax.experimental.pallas import tpu as pltpu


# ----------------------------------------------------------------------------
# Tiling helpers
# ----------------------------------------------------------------------------
def _pick_tile(total: int, pref: int, align: int) -> int:
    """Largest multiple of `align` that divides `total` and is <= `pref`.

    Falls back to the full dimension (always a legal BlockSpec block)."""
    if total <= pref:
        return total
    cand = (pref // align) * align
    while cand >= align:
        if total % cand == 0:
            return cand
        cand -= align
    return total


# ----------------------------------------------------------------------------
# Fused core (synthetic prefix attention) + tied lm_head kernel
# ----------------------------------------------------------------------------
def _make_core_lm_kernel(n_layer: int, has_latent: bool, d: int):
    scale = 1.0 / math.sqrt(d)

    def kernel(*refs):
        if has_latent:
            x_ref, pc_ref, z_ref, w_ref, out_ref, h_ref = refs
        else:
            x_ref, pc_ref, w_ref, out_ref, h_ref = refs
            z_ref = None

        # --------------------------------------------------------------
        # Prefix cross-attention: computed ONCE per T-tile (V is the inner
        # grid axis), cached in a bf16 VMEM scratch, reused for all V tiles.
        # --------------------------------------------------------------
        @pl.when(pl.program_id(1) == 0)
        def _compute_hidden():
            h = x_ref[...].astype(jnp.float32)               # [B, tT, D]
            p_persona = pc_ref[:, 0:1, :]                    # [B, 1, D]
            p_context = pc_ref[:, 1:2, :]                    # [B, 1, D]
            # TODO(synk): the real `core_module` is an external GPT-2-like
            # transformer consuming extra_hidden_states; replaced here by a
            # synthetic per-layer prefix cross-attention (residual).
            for l in range(n_layer):                         # static unroll
                prefs = [p_persona, p_context]
                if has_latent:
                    prefs.append(z_ref[l][:, None, :])       # [B, 1, D]
                # P is 2 or 3 -> keep on VPU/XLU (broadcast-mul + lane
                # reduce); the MXU would be >40x under-utilized here.
                scores = [jnp.sum(h * p, axis=-1, keepdims=True) * scale
                          for p in prefs]                    # each [B, tT, 1]
                m = scores[0]
                for s in scores[1:]:
                    m = jnp.maximum(m, s)
                exps = [jnp.exp(s - m) for s in scores]
                denom = exps[0]
                for e in exps[1:]:
                    denom = denom + e
                inv = pl.reciprocal(denom, approx=True)      # EUP slot (free)
                upd = (exps[0] * inv) * prefs[0]
                for e, p in zip(exps[1:], prefs[1:]):
                    upd = upd + (e * inv) * p
                h = h + upd
            h_ref[...] = h.astype(jnp.bfloat16)

        # --------------------------------------------------------------
        # Tied lm_head tile: [B, tT, D] bf16 @ [D, tV] bf16 -> f32 accum.
        # --------------------------------------------------------------
        out_ref[...] = lax.dot_general(
            h_ref[...], w_ref[...],
            dimension_numbers=(((2,), (0,)), ((), ())),
            preferred_element_type=jnp.float32).astype(out_ref.dtype)

    return kernel


def core_and_lm_head_pallas(x_emb, pc, z_chunks, w_t_bf16, n_layer,
                            out_dtype=jnp.float32,
                            tile_t_pref=256, tile_v_pref=512):
    b, t, d = x_emb.shape
    v = w_t_bf16.shape[1]
    has_latent = z_chunks is not None
    n_prefix = 3 if has_latent else 2

    tt = _pick_tile(t, pref=tile_t_pref, align=8)      # f32 sublane multiple
    tv = _pick_tile(v, pref=tile_v_pref, align=128)    # lane-dense stores
    grid = (t // tt, v // tv)

    in_specs = [
        pl.BlockSpec((b, tt, d), lambda i, j: (0, i, 0)),   # token embeddings
        pl.BlockSpec((b, 2, d), lambda i, j: (0, 0, 0)),    # persona+context
    ]
    args = [x_emb, pc]
    if has_latent:
        in_specs.append(pl.BlockSpec((n_layer, b, d), lambda i, j: (0, 0, 0)))
        args.append(z_chunks)
    in_specs.append(pl.BlockSpec((d, tv), lambda i, j: (0, j)))  # [D, V] weight
    args.append(w_t_bf16)

    out_specs = pl.BlockSpec((b, tt, tv), lambda i, j: (0, i, j))

    out_bytes = jnp.dtype(out_dtype).itemsize
    flops = 2 * b * t * d * v + n_layer * 4 * b * t * d * n_prefix
    transcendentals = n_layer * b * t * (n_prefix + 1)
    bytes_accessed = int(
        x_emb.size * 4 + pc.size * 4
        + (z_chunks.size * 4 if has_latent else 0)
        + (t // tt) * w_t_bf16.size * 2       # weight re-streamed per T tile
        + b * t * v * out_bytes)

    # VMEM budget (double-buffered tiles + scratch), sized with headroom but
    # kept well below the 64 MiB v7x ceiling.
    vmem_est = (2 * b * tt * d * 4            # x tiles
                + 2 * d * tv * 2              # weight tiles (bf16)
                + 2 * b * tt * tv * out_bytes  # logits tiles
                + b * tt * d * 2              # h scratch (bf16)
                + b * 2 * d * 4
                + (n_layer * b * d * 4 if has_latent else 0))
    vmem_limit = int(min(max(3 * vmem_est, 8 * 1024 * 1024), 40 * 1024 * 1024))

    kernel = _make_core_lm_kernel(n_layer, has_latent, d)

    return pl.pallas_call(
        kernel,
        out_shape=jax.ShapeDtypeStruct((b, t, v), out_dtype),
        grid_spec=pltpu.PrefetchScalarGridSpec(
            num_scalar_prefetch=0,
            grid=grid,
            in_specs=in_specs,
            out_specs=out_specs,
            scratch_shapes=[pltpu.VMEM((b, tt, d), jnp.bfloat16)],
        ),
        compiler_params=pltpu.CompilerParams(
            dimension_semantics=("parallel", "arbitrary"),
            vmem_limit_bytes=vmem_limit,
        ),
        cost_estimate=pl.CostEstimate(
            flops=flops,
            transcendentals=transcendentals,
            bytes_accessed=bytes_accessed),
    )(*args)


# ----------------------------------------------------------------------------
# Module wrapper (mirrors CVAECompressedDecoder.forward)
# ----------------------------------------------------------------------------
class CVAECompressedDecoderPallas:
    def __init__(self, key, vocab_size, pad_id, z_dim, embed_dim, n_layer):
        self.pad_id = pad_id
        self.z_dim = z_dim
        self.embed_dim = embed_dim
        self.n_layer = n_layer
        k_wte, k_lat = jax.random.split(key)
        # core_module.wte.weight -> [V, D]  (also the tied lm_head weight)
        self.wte = (0.02 * jax.random.normal(k_wte, (vocab_size, embed_dim))
                    ).astype(jnp.float32)
        # latent_head: nn.Linear(z_dim, embed_dim * n_layer, bias=False)
        # PyTorch weight shape: [embed_dim * n_layer, z_dim]
        self.latent_head_w = (0.02 * jax.random.normal(
            k_lat, (embed_dim * n_layer, z_dim))).astype(jnp.float32)
        # Precomputed once (not per call): transposed latent_head weight and
        # pre-transposed bf16 lm_head weight [D, V] for the MXU.
        self.latent_head_w_t = self.latent_head_w.T                 # [Z, L*D]
        self.lm_head_w_t_bf16 = self.wte.T.astype(jnp.bfloat16)     # [D, V]

    def __call__(self, persona_embedding, context_embedding, input_ids,
                 latent_sample=None):
        B = persona_embedding.shape[0]
        L, D = self.n_layer, self.embed_dim

        # persona/context passed once (NOT broadcast to [L, B, P, D]).
        pc = jnp.stack([persona_embedding, context_embedding], axis=1)  # [B,2,D]

        if latent_sample is None:
            z_chunks = None
        else:
            # Tiny [B,Z]@[Z,L*D] matmul: plain jnp so XLA fuses it; weight was
            # pre-transposed once in __init__ (no Pallas launch overhead).
            eh = latent_sample @ self.latent_head_w_t                   # [B, L*D]
            z_chunks = eh.reshape(B, L, D).transpose(1, 0, 2)           # [L, B, D]

        # Embedding gather (data-dependent) stays in plain JAX.
        x_emb = self.wte[input_ids]                                     # [B, T, D]

        return core_and_lm_head_pallas(
            x_emb, pc, z_chunks, self.lm_head_w_t_bf16, L)              # [B, T, V]

    # pure-JAX f32 reference (same math, no Pallas / no bf16) for verification
    def reference(self, persona_embedding, context_embedding, input_ids,
                  latent_sample=None):
        B = persona_embedding.shape[0]
        L, D = self.n_layer, self.embed_dim
        persona = persona_embedding[:, None, :]
        context = context_embedding[:, None, :]
        if latent_sample is None:
            prefix = jnp.concatenate([persona, context], axis=1)
            prefixes = jnp.broadcast_to(prefix[None], (L, B, 2, D))
        else:
            eh = latent_sample @ self.latent_head_w.T
            z_chunks = eh.reshape(B, L, D).transpose(1, 0, 2)
            pcc = jnp.broadcast_to(
                jnp.concatenate([persona, context], axis=1)[None], (L, B, 2, D))
            prefixes = jnp.concatenate([pcc, z_chunks[:, :, None, :]], axis=2)
        h = self.wte[input_ids]
        scale = 1.0 / math.sqrt(D)
        for l in range(L):
            pfx = prefixes[l]
            s = jnp.einsum('btd,bpd->btp', h, pfx) * scale
            p = jax.nn.softmax(s, axis=-1)
            h = h + jnp.einsum('btp,bpd->btd', p, pfx)
        return jnp.einsum('btd,vd->btv', h, self.wte)


# ----------------------------------------------------------------------------
# Demo
# ----------------------------------------------------------------------------
if __name__ == "__main__":
    B, T, D = 2, 16, 32         # batch, seq, embed_dim
    Z, L, V = 16, 2, 1024       # z_dim, n_layer, vocab (2 V-tiles at tV=512)
    PAD_ID = 0

    key = jax.random.PRNGKey(0)
    k_model, k_p, k_c, k_z, k_ids = jax.random.split(key, 5)

    model = CVAECompressedDecoderPallas(k_model, V, PAD_ID, Z, D, L)

    persona = jax.random.normal(k_p, (B, D), dtype=jnp.float32)
    context = jax.random.normal(k_c, (B, D), dtype=jnp.float32)
    latent = jax.random.normal(k_z, (B, Z), dtype=jnp.float32)
    input_ids = jax.random.randint(k_ids, (B, T), 0, V, dtype=jnp.int32)

    # path with latent_sample (P = 3)
    logits_lat = jax.block_until_ready(
        model(persona, context, input_ids, latent_sample=latent))
    ref_lat = model.reference(persona, context, input_ids, latent_sample=latent)
    assert logits_lat.shape == (B, T, V)
    # bf16 MXU operands (f32 accumulation) + approx reciprocal -> relaxed tol
    assert jnp.allclose(logits_lat, ref_lat, atol=2e-2, rtol=2e-2), (
        float(jnp.max(jnp.abs(logits_lat - ref_lat))))

    # path without latent_sample (P = 2)
    logits_nolat = jax.block_until_ready(
        model(persona, context, input_ids, latent_sample=None))
    ref_nolat = model.reference(persona, context, input_ids, latent_sample=None)
    assert logits_nolat.shape == (B, T, V)
    assert jnp.allclose(logits_nolat, ref_nolat, atol=2e-2, rtol=2e-2), (
        float(jnp.max(jnp.abs(logits_nolat - ref_nolat))))

    print("KERNEL_OK")
</pallas_src>

<mosaic_0001>
module attributes {stable_mosaic.version = 11 : i64} {
  func.func @kernel(%arg0: i32, %arg1: i32, %arg2: memref<2x16x32xf32, #tpu.memory_space<vmem>>, %arg3: memref<2x2x32xf32, #tpu.memory_space<vmem>>, %arg4: memref<2x2x32xf32, #tpu.memory_space<vmem>>, %arg5: memref<32x512xbf16, #tpu.memory_space<vmem>>, %arg6: memref<2x16x512xf32, #tpu.memory_space<vmem>>, %arg7: memref<2x16x32xbf16, #tpu.memory_space<vmem>>) attributes {dimension_semantics = [#tpu.dimension_semantics<parallel>, #tpu.dimension_semantics<arbitrary>], iteration_bounds = array<i64: 1, 2>, scalar_prefetch = 0 : i64, scratch_operands = 1 : i64, tpu.core_type = #tpu.core_type<tc>, window_params = [{transform_indices = @transform_0, window_bounds = array<i64: 2, 16, 32>}, {pipeline_mode = #tpu.pipeline_mode<synchronous>, transform_indices = @transform_1, window_bounds = array<i64: 2, 2, 32>}, {pipeline_mode = #tpu.pipeline_mode<synchronous>, transform_indices = @transform_2, window_bounds = array<i64: 2, 2, 32>}, {transform_indices = @transform_3, window_bounds = array<i64: 32, 512>}, {transform_indices = @transform_4, window_bounds = array<i64: 2, 16, 512>}]} {
    %c0_i32 = arith.constant 0 : i32
    %0 = arith.cmpi eq, %arg1, %c0_i32 : i32
    %1 = arith.extui %0 : i1 to i32
    %c0_i32_0 = arith.constant 0 : i32
    %2 = arith.cmpi ne, %1, %c0_i32_0 : i32
    scf.if %2 {
      %c0_8 = arith.constant 0 : index
      %c0_9 = arith.constant 0 : index
      %c0_10 = arith.constant 0 : index
      %7 = vector.load %arg2[%c0_8, %c0_9, %c0_10] : memref<2x16x32xf32, #tpu.memory_space<vmem>>, vector<2x16x32xf32>
      %c0_11 = arith.constant 0 : index
      %c0_12 = arith.constant 0 : index
      %c0_13 = arith.constant 0 : index
      %8 = vector.load %arg3[%c0_11, %c0_12, %c0_13] : memref<2x2x32xf32, #tpu.memory_space<vmem>>, vector<2x1x32xf32>
      %c0_14 = arith.constant 0 : index
      %c1 = arith.constant 1 : index
      %c0_15 = arith.constant 0 : index
      %9 = vector.load %arg3[%c0_14, %c1, %c0_15] : memref<2x2x32xf32, #tpu.memory_space<vmem>>, vector<2x1x32xf32>
      %c0_16 = arith.constant 0 : index
      %c0_17 = arith.constant 0 : index
      %c0_18 = arith.constant 0 : index
      %10 = vector.load %arg4[%c0_16, %c0_17, %c0_18] : memref<2x2x32xf32, #tpu.memory_space<vmem>>, vector<1x2x32xf32>
      %11 = vector.shape_cast %10 : vector<1x2x32xf32> to vector<2x32xf32>
      %12 = vector.shape_cast %11 : vector<2x32xf32> to vector<2x1x32xf32>
      %13 = vector.broadcast %8 : vector<2x1x32xf32> to vector<2x16x32xf32>
      %14 = arith.mulf %7, %13 : vector<2x16x32xf32>
      %cst_19 = arith.constant dense<0.000000e+00> : vector<2x16xf32>
      %15 = vector.multi_reduction <add>, %14, %cst_19 [2] : vector<2x16x32xf32> to vector<2x16xf32>
      %16 = vector.shape_cast %15 : vector<2x16xf32> to vector<2x16x1xf32>
      %cst_20 = arith.constant 0.176776692 : f32
      %17 = vector.broadcast %cst_20 : f32 to vector<2x16x1xf32>
      %18 = arith.mulf %16, %17 : vector<2x16x1xf32>
      %19 = vector.broadcast %9 : vector<2x1x32xf32> to vector<2x16x32xf32>
      %20 = arith.mulf %7, %19 : vector<2x16x32xf32>
      %cst_21 = arith.constant dense<0.000000e+00> : vector<2x16xf32>
      %21 = vector.multi_reduction <add>, %20, %cst_21 [2] : vector<2x16x32xf32> to vector<2x16xf32>
      %22 = vector.shape_cast %21 : vector<2x16xf32> to vector<2x16x1xf32>
      %cst_22 = arith.constant 0.176776692 : f32
      %23 = vector.broadcast %cst_22 : f32 to vector<2x16x1xf32>
      %24 = arith.mulf %22, %23 : vector<2x16x1xf32>
      %25 = vector.broadcast %12 : vector<2x1x32xf32> to vector<2x16x32xf32>
      %26 = arith.mulf %7, %25 : vector<2x16x32xf32>
      %cst_23 = arith.constant dense<0.000000e+00> : vector<2x16xf32>
      %27 = vector.multi_reduction <add>, %26, %cst_23 [2] : vector<2x16x32xf32> to vector<2x16xf32>
      %28 = vector.shape_cast %27 : vector<2x16xf32> to vector<2x16x1xf32>
      %cst_24 = arith.constant 0.176776692 : f32
      %29 = vector.broadcast %cst_24 : f32 to vector<2x16x1xf32>
      %30 = arith.mulf %28, %29 : vector<2x16x1xf32>
      %31 = arith.maximumf %18, %24 : vector<2x16x1xf32>
      %32 = arith.maximumf %31, %30 : vector<2x16x1xf32>
      %33 = arith.subf %18, %32 : vector<2x16x1xf32>
      %34 = math.exp %33 : vector<2x16x1xf32>
      %35 = arith.subf %24, %32 : vector<2x16x1xf32>
      %36 = math.exp %35 : vector<2x16x1xf32>
      %37 = arith.subf %30, %32 : vector<2x16x1xf32>
      %38 = math.exp %37 : vector<2x16x1xf32>
      %39 = arith.addf %34, %36 : vector<2x16x1xf32>
      %40 = arith.addf %39, %38 : vector<2x16x1xf32>
      %41 = tpu.reciprocal %40 {approx = true} : vector<2x16x1xf32> -> vector<2x16x1xf32>
      %42 = arith.mulf %34, %41 : vector<2x16x1xf32>
      %43 = vector.broadcast %42 : vector<2x16x1xf32> to vector<2x16x32xf32>
      %44 = vector.broadcast %8 : vector<2x1x32xf32> to vector<2x16x32xf32>
      %45 = arith.mulf %43, %44 : vector<2x16x32xf32>
      %46 = arith.mulf %36, %41 : vector<2x16x1xf32>
      %47 = vector.broadcast %46 : vector<2x16x1xf32> to vector<2x16x32xf32>
      %48 = vector.broadcast %9 : vector<2x1x32xf32> to vector<2x16x32xf32>
      %49 = arith.mulf %47, %48 : vector<2x16x32xf32>
      %50 = arith.addf %45, %49 : vector<2x16x32xf32>
      %51 = arith.mulf %38, %41 : vector<2x16x1xf32>
      %52 = vector.broadcast %51 : vector<2x16x1xf32> to vector<2x16x32xf32>
      %53 = vector.broadcast %12 : vector<2x1x32xf32> to vector<2x16x32xf32>
      %54 = arith.mulf %52, %53 : vector<2x16x32xf32>
      %55 = arith.addf %50, %54 : vector<2x16x32xf32>
      %56 = arith.addf %7, %55 : vector<2x16x32xf32>
      %c1_25 = arith.constant 1 : index
      %c0_26 = arith.constant 0 : index
      %c0_27 = arith.constant 0 : index
      %57 = vector.load %arg4[%c1_25, %c0_26, %c0_27] : memref<2x2x32xf32, #tpu.memory_space<vmem>>, vector<1x2x32xf32>
      %58 = vector.shape_cast %57 : vector<1x2x32xf32> to vector<2x32xf32>
      %59 = vector.shape_cast %58 : vector<2x32xf32> to vector<2x1x32xf32>
      %60 = vector.broadcast %8 : vector<2x1x32xf32> to vector<2x16x32xf32>
      %61 = arith.mulf %56, %60 : vector<2x16x32xf32>
      %cst_28 = arith.constant dense<0.000000e+00> : vector<2x16xf32>
      %62 = vector.multi_reduction <add>, %61, %cst_28 [2] : vector<2x16x32xf32> to vector<2x16xf32>
      %63 = vector.shape_cast %62 : vector<2x16xf32> to vector<2x16x1xf32>
      %cst_29 = arith.constant 0.176776692 : f32
      %64 = vector.broadcast %cst_29 : f32 to vector<2x16x1xf32>
      %65 = arith.mulf %63, %64 : vector<2x16x1xf32>
      %66 = vector.broadcast %9 : vector<2x1x32xf32> to vector<2x16x32xf32>
      %67 = arith.mulf %56, %66 : vector<2x16x32xf32>
      %cst_30 = arith.constant dense<0.000000e+00> : vector<2x16xf32>
      %68 = vector.multi_reduction <add>, %67, %cst_30 [2] : vector<2x16x32xf32> to vector<2x16xf32>
      %69 = vector.shape_cast %68 : vector<2x16xf32> to vector<2x16x1xf32>
      %cst_31 = arith.constant 0.176776692 : f32
      %70 = vector.broadcast %cst_31 : f32 to vector<2x16x1xf32>
      %71 = arith.mulf %69, %70 : vector<2x16x1xf32>
      %72 = vector.broadcast %59 : vector<2x1x32xf32> to vector<2x16x32xf32>
      %73 = arith.mulf %56, %72 : vector<2x16x32xf32>
      %cst_32 = arith.constant dense<0.000000e+00> : vector<2x16xf32>
      %74 = vector.multi_reduction <add>, %73, %cst_32 [2] : vector<2x16x32xf32> to vector<2x16xf32>
      %75 = vector.shape_cast %74 : vector<2x16xf32> to vector<2x16x1xf32>
      %cst_33 = arith.constant 0.176776692 : f32
      %76 = vector.broadcast %cst_33 : f32 to vector<2x16x1xf32>
      %77 = arith.mulf %75, %76 : vector<2x16x1xf32>
      %78 = arith.maximumf %65, %71 : vector<2x16x1xf32>
      %79 = arith.maximumf %78, %77 : vector<2x16x1xf32>
      %80 = arith.subf %65, %79 : vector<2x16x1xf32>
      %81 = math.exp %80 : vector<2x16x1xf32>
      %82 = arith.subf %71, %79 : vector<2x16x1xf32>
      %83 = math.exp %82 : vector<2x16x1xf32>
      %84 = arith.subf %77, %79 : vector<2x16x1xf32>
      %85 = math.exp %84 : vector<2x16x1xf32>
      %86 = arith.addf %81, %83 : vector<2x16x1xf32>
      %87 = arith.addf %86, %85 : vector<2x16x1xf32>
      %88 = tpu.reciprocal %87 {approx = true} : vector<2x16x1xf32> -> vector<2x16x1xf32>
      %89 = arith.mulf %81, %88 : vector<2x16x1xf32>
      %90 = vector.broadcast %89 : vector<2x16x1xf32> to vector<2x16x32xf32>
      %91 = vector.broadcast %8 : vector<2x1x32xf32> to vector<2x16x32xf32>
      %92 = arith.mulf %90, %91 : vector<2x16x32xf32>
      %93 = arith.mulf %83, %88 : vector<2x16x1xf32>
      %94 = vector.broadcast %93 : vector<2x16x1xf32> to vector<2x16x32xf32>
      %95 = vector.broadcast %9 : vector<2x1x32xf32> to vector<2x16x32xf32>
      %96 = arith.mulf %94, %95 : vector<2x16x32xf32>
      %97 = arith.addf %92, %96 : vector<2x16x32xf32>
      %98 = arith.mulf %85, %88 : vector<2x16x1xf32>
      %99 = vector.broadcast %98 : vector<2x16x1xf32> to vector<2x16x32xf32>
      %100 = vector.broadcast %59 : vector<2x1x32xf32> to vector<2x16x32xf32>
      %101 = arith.mulf %99, %100 : vector<2x16x32xf32>
      %102 = arith.addf %97, %101 : vector<2x16x32xf32>
      %103 = arith.addf %56, %102 : vector<2x16x32xf32>
      %104 = arith.truncf %103 : vector<2x16x32xf32> to vector<2x16x32xbf16>
      %c0_34 = arith.constant 0 : index
      %c0_35 = arith.constant 0 : index
      %c0_36 = arith.constant 0 : index
      %105 = vector.load %arg7[%c0_34, %c0_35, %c0_36] : memref<2x16x32xbf16, #tpu.memory_space<vmem>>, vector<2x16x32xbf16>
      tpu.vector_store %arg7[%c0_34, %c0_35, %c0_36], %104 {strides = array<i32>} : memref<2x16x32xbf16, #tpu.memory_space<vmem>>, vector<2x16x32xbf16>,
    } else {
    }
    %c0 = arith.constant 0 : index
    %c0_1 = arith.constant 0 : index
    %c0_2 = arith.constant 0 : index
    %3 = vector.load %arg7[%c0, %c0_1, %c0_2] : memref<2x16x32xbf16, #tpu.memory_space<vmem>>, vector<2x16x32xbf16>
    %c0_3 = arith.constant 0 : index
    %c0_4 = arith.constant 0 : index
    %4 = vector.load %arg5[%c0_3, %c0_4] : memref<32x512xbf16, #tpu.memory_space<vmem>>, vector<32x512xbf16>
    %cst = arith.constant dense<0.000000e+00> : vector<2x16x512xf32>
    %5 = tpu.matmul %3, %4, %cst {dimension_numbers = #tpu.dot_dimension_numbers<[2], [0], [0, 1], [1], [0, 0, 0, 1, 1, 1], [], []>} : vector<2x16x32xbf16>, vector<32x512xbf16>, vector<2x16x512xf32> -> vector<2x16x512xf32>
    %c0_5 = arith.constant 0 : index
    %c0_6 = arith.constant 0 : index
    %c0_7 = arith.constant 0 : index
    %6 = vector.load %arg6[%c0_5, %c0_6, %c0_7] : memref<2x16x512xf32, #tpu.memory_space<vmem>>, vector<2x16x512xf32>
    tpu.vector_store %arg6[%c0_5, %c0_6, %c0_7], %5 {strides = array<i32>} : memref<2x16x512xf32, #tpu.memory_space<vmem>>, vector<2x16x512xf32>,
    return
  }
  func.func @transform_0(%arg0: i32, %arg1: i32) -> (i32, i32, i32) {
    %c0_i32 = arith.constant 0 : i32
    %c0_i32_0 = arith.constant 0 : i32
    %c0_i32_1 = arith.constant 0 : i32
    return %c0_i32, %arg0, %c0_i32_0 : i32, i32, i32
  }
  func.func @transform_1(%arg0: i32, %arg1: i32) -> (i32, i32, i32) {
    %c0_i32 = arith.constant 0 : i32
    %c0_i32_0 = arith.constant 0 : i32
    %c0_i32_1 = arith.constant 0 : i32
    %c0_i32_2 = arith.constant 0 : i32
    return %c0_i32, %c0_i32_0, %c0_i32_1 : i32, i32, i32
  }
  func.func @transform_2(%arg0: i32, %arg1: i32) -> (i32, i32, i32) {
    %c0_i32 = arith.constant 0 : i32
    %c0_i32_0 = arith.constant 0 : i32
    %c0_i32_1 = arith.constant 0 : i32
    %c0_i32_2 = arith.constant 0 : i32
    return %c0_i32, %c0_i32_0, %c0_i32_1 : i32, i32, i32
  }
  func.func @transform_3(%arg0: i32, %arg1: i32) -> (i32, i32) {
    %c0_i32 = arith.constant 0 : i32
    %c0_i32_0 = arith.constant 0 : i32
    return %c0_i32, %arg1 : i32, i32
  }
  func.func @transform_4(%arg0: i32, %arg1: i32) -> (i32, i32, i32) {
    %c0_i32 = arith.constant 0 : i32
    %c0_i32_0 = arith.constant 0 : i32
    return %c0_i32, %arg0, %arg1 : i32, i32, i32
  }
}

</mosaic_0001>

<bundles_post_ra>
// kernel: tpu_custom_call.1
= control target key start
LH: loop header
LB: loop body
LE: loop exit
PB: predicated region body
PF: predicated region fallthrough
CT: control target
= control target key end

     0   :  { %9 = vsyncpa [#allocation4], 0  ;;  %s1855_s0 = inlined_call_operand.hbm [shape: f32[2,16,32], index: 0, kind: input, shape index: {}]   ;;  %s1856_s1 = inlined_call_operand.hbm [shape: f32[2,2,32], index: 1, kind: input, shape index: {}]   ;;  %s1857_s2 = inlined_call_operand.vmem [shape: f32[2,2,32], index: 2, kind: input, shape index: {}]   ;;  %s1858_s3 = inlined_call_operand.hbm [shape: bf16[32,1024], index: 3, kind: input, shape index: {}]   ;;  %s1859_s4 = inlined_call_operand.hbm [shape: f32[2,16,1024], index: 4, kind: output, shape index: {}]  }
   0x1   :  { %10 = vsyncpa [#allocation7], 0 }
   0x2   :  { %11 = vsyncpa [#allocation5], 0 }
   0x3   :  { %13 = vsyncpa [#allocation5 + $0x1], 0  ;;  %s1408_s15 = smov 0   ;;  %s1410_s16 = smov 0  }
   0x4   :  { %s1412_s17 = smov 0   ;;  %s1414_s18 = smov 0  }
   0x5   :  { %s1416_s19 = smov 0   ;;  %s1418_s20 = smov 0  }
   0x6 LB: > { %s1439_s21 = sadd.s32 4294967295, %s1365_s20   ;;  %s978_s22 = sadd.s32 4294967294, %s1365_s20   ;;  %s1365_s20 = sphi %s1418_s20, %s19_s20   ;;  %s1361_s19 = sphi %s1416_s19, %s1883_s19   ;;  %s1357_s18 = sphi %s1414_s18, %s1882_s18   ;;  %s1353_s17 = sphi %s1412_s17, %s1881_s17   ;;  %s1349_s16 = sphi %s1410_s16, %s1880_s16   ;;  %s1345_s15 = sphi %s1408_s15, %s1879_s15  }
   0x7   : > { %p113_p0 = scmp.ne.s32.totalorder %s1353_s17, %s1349_s16  ;;  %p114_p1 = scmp.eq.s32.totalorder %s1365_s20, 0 }
   0x8   : > { %p119_p2 = scmp.ne.s32.totalorder %s1349_s16, %s1345_s15  ;;  %p1860_p3 = scmp.eq.s32.totalorder %s1439_s21, 0 }
   0x9   : > { %p145_p4 = scmp.eq.s32.totalorder %s1439_s21, 1  ;;  %p1450_p5 = por %p114_p1, %p113_p0 }
   0xa   : > { %p151_p6 = scmp.eq.s32.totalorder %s978_s22, 1  ;;  %p1456_p7 = por %p1860_p3, %p119_p2 }
   0xb   : > { %p1460_p8 = por %p145_p4, %p113_p0  ;;  %p979_p10 = scmp.ge.s32.totalorder %s1365_s20, 1 }
   0xc   : > { %s1864_s25 = scalar_select %p1456_p7, 1, 0 }
   0xd   : > { %s1865_s26 = scalar_select %p1460_p8, 1, 0 }
   0xe   : > { %p1464_p9 = por %p151_p6, %p119_p2  ;;  %p158_p11 = scmp.lt.s32.totalorder %s1365_s20, 3 }
   0xf   : > { %s1367_s29 = smov [#allocation3]   ;;  %p1047_p1 = scmp.lt.s32.totalorder %s1365_s20, 2 }
  0x10   : > { %s1866_s27 = scalar_select %p1464_p9, 1, 0 }
  0x11   : > { %p1470_p12 = pnand %p979_p10, %p158_p11  ;;  %s173_s30 = sshll.u32 %s1367_s29, 4  ;;  %s1474_s30 = int_to_ptr.vmem [resolvable:$true] %s173_s30 }
  0x12   : > { %s1368_s6 = smov [#allocation6]   ;;  %p1488_p4 = pnand %p1047_p1, %p1450_p5 }
  0x13   : > { %p1030_p13 = pneg %p1470_p12  ;;  %s186_s7 = sshll.u32 %s1368_s6, 4  ;;  %s1492_s7 = int_to_ptr.vmem [resolvable:$true] %s186_s7 }
  0x14   : > { %s1189_s11 = scalar_lea.hbm %s1855_s0, 512 }
  0x15   : > { %p1482_p2 = pnand %p1030_p13, %p1860_p3  ;;  %p1190_p6 = scmp.ne.s32.totalorder %s1855_s0, %s1189_s11 }
  0x16   : > { %p1196_p5 = scmp.lt.u32.totalorder %s1189_s11, %s1855_s0 }
  0x17   : > { %p1191_p10 = pneg %p1482_p2 }
  0x19   : > { %p1192_p11 = pnand %p1191_p10, %p1190_p6 }
  0x1b   : > { %p1193_p13 = pneg %p1192_p11 }
  0x1d   : > { %p1198_p1 = pnand %p1196_p5, %p1193_p13 }
  0x1f   : > { %1201 = shalt.err (!%p1198_p1)
}
  0x20   : > { %s1202_s24 = scalar_lea.vmem %s1474_s30, 512  ;;  %p1210_p8 = scmp.lt.s32.totalorder %s1474_s30, %s1474_s30 }
  0x21   : > { %p1203_p0 = scmp.ne.s32.totalorder %s1474_s30, %s1202_s24  ;;  %p1211_p6 = scmp.lt.s32.totalorder %s1202_s24, %s1202_s24 }
  0x23   : > { %p1205_p3 = pnand %p1203_p0, %p1191_p10  ;;  %p1212_p11 = por %p1211_p6, %p1210_p8 }
  0x25   : > { %p1206_p9 = pneg %p1205_p3 }
  0x27   : > { %p1213_p7 = pnand %p1212_p11, %p1206_p9 }
  0x29   : > { %1216 = shalt.err (!%p1213_p7)
}
  0x2a   : > { %s1369_s29 = smov 128   ;;  %s1370_s6 = smov 8  }
  0x2b   : > { %1033 = dma.hbm_to_vmem [thread:$0]  (!%p1482_p2), %s1855_s0, 512, %s1474_s30, [#allocation4], %s1369_s29, %s1369_s29, %s1370_s6  }
  0x2c   : > { %s1217_s13 = scalar_lea.hbm %s1856_s1, 64 }
  0x2d   : > { %p1218_p3 = scmp.ne.s32.totalorder %s1856_s1, %s1217_s13  ;;  %p1224_p9 = scmp.lt.u32.totalorder %s1217_s13, %s1856_s1 }
  0x2f   : > { %p1220_p7 = pnand %p1218_p3, %p1191_p10 }
  0x31   : > { %p1221_p8 = pneg %p1220_p7 }
  0x33   : > { %p1226_p0 = pnand %p1224_p9, %p1221_p8 }
  0x35   : > { %1229 = shalt.err (!%p1226_p0)
}
  0x36   : > { %s1230_s30 = scalar_lea.vmem %s1492_s7, 64  ;;  %p1238_p6 = scmp.lt.s32.totalorder %s1492_s7, %s1492_s7 }
  0x37   : > { %p1231_p13 = scmp.ne.s32.totalorder %s1492_s7, %s1230_s30  ;;  %p1239_p11 = scmp.lt.s32.totalorder %s1230_s30, %s1230_s30 }
  0x39   : > { %p1233_p5 = pnand %p1231_p13, %p1191_p10  ;;  %p1240_p3 = por %p1239_p11, %p1238_p6 }
  0x3b   : > { %p1234_p1 = pneg %p1233_p5 }
  0x3d   : > { %p1241_p7 = pnand %p1240_p3, %p1234_p1 }
  0x3f   : > { %1244 = shalt.err (!%p1241_p7)
}
  0x40   : > { %s1371_s23 = smov 32   ;;  %s1372_s29 = smov 2  }
  0x41   : > { %1036 = dma.hbm_to_vmem [thread:$0]  (!%p1482_p2), %s1856_s1, 64, %s1492_s7, [#allocation7], %s1371_s23, %s1371_s23, %s1372_s29  }
  0x42   : > { %s203_s10 = sand.u32 1, %s1365_s20   ;;  %s28_s11 = sadd.s32 1, %s1361_s19 }
  0x43   : > { %s205_s12 = sand.u32 1, %s1353_s17   ;;  %p29_p10 = scmp.ge.s32.totalorder %s28_s11, 2 }
  0x44   : > { %s983_s13 = sshll.u32 %s205_s12, 6  ;;  %s1016_s14 = sshll.u32 %s1361_s19, 8 }
  0x45   : > { %s1885_s11 = smov (%p29_p10, %s28_s11), 0  ;;  %s1555_s30 = scalar_lea.hbm %s1858_s3, %s1016_s14 }
  0x46   : > { %s207_s5 = scalar_lea.vmem [#allocation8], %s983_s13  ;;  %s103_s23 = ssub.s32 %s1361_s19, %s1885_s11 }
  0x47   : > { %s214_s7 = sshll.u32 %s207_s5, 4  ;;  %p104_p2 = scmp.eq.s32.totalorder %s103_s23, 0  ;;  %s1559_s7 = int_to_ptr.vmem [resolvable:$true] %s214_s7 }
  0x48   : > { %s1870_s29 = sadd.s32 1, %s1353_s17  ;;  %s1566_s9 = scalar_lea.sflag [#allocation4], %s203_s10 }
  0x49   : > { %s1564_s6 = scalar_select %p104_p2, %s1353_s17, %s1870_s29  }
  0x4a   : > { %s1245_s12 = scalar_lea.hbm %s1555_s30, 1024  ;;  %p1247_p9 = pneg %p1488_p4 }
  0x4b   : > { %p1246_p8 = scmp.ne.s32.totalorder %s1555_s30, %s1245_s12  ;;  %s1250_s22 = scalar_lea.hbm %s1858_s3, 2048 }
  0x4c   : > { %p1251_p5 = scmp.lt.u32.totalorder %s1555_s30, %s1858_s3  ;;  %p1252_p1 = scmp.lt.u32.totalorder %s1250_s22, %s1245_s12 }
  0x4d   : > { %p1248_p0 = pnand %p1247_p9, %p1246_p8  ;;  %p1254_p11 = scmp.lt.u32.totalorder %s1245_s12, %s1555_s30 }
  0x4e   : > { %p1253_p6 = por %p1252_p1, %p1251_p5 }
  0x4f   : > { %p1249_p13 = pneg %p1248_p0 }
  0x50   : > { %p1255_p3 = por %p1254_p11, %p1253_p6 }
  0x52   : > { %p1256_p7 = pnand %p1255_p3, %p1249_p13 }
  0x54   : > { %1259 = shalt.err (!%p1256_p7)
}
  0x55   : > { %s1260_s10 = scalar_lea.vmem %s1559_s7, 1024  ;;  %s1373_s23 = smov [#allocation8]  }
  0x56   : > { %p1261_p10 = scmp.ne.s32.totalorder %s1559_s7, %s1260_s10  ;;  %s1265_s29 = sshll.u32 %s1373_s23, 4  ;;  %s1266_s29 = int_to_ptr.vmem [resolvable:$false] %s1265_s29 }
  0x57   : > { %s1267_s13 = scalar_lea.vmem %s1266_s29, 2048  ;;  %p1268_p0 = scmp.lt.s32.totalorder %s1559_s7, %s1266_s29 }
  0x58   : > { %p1263_p2 = pnand %p1261_p10, %p1247_p9  ;;  %p1269_p5 = scmp.lt.s32.totalorder %s1267_s13, %s1260_s10 }
  0x5a   : > { %p1264_p8 = pneg %p1263_p2  ;;  %p1270_p1 = por %p1269_p5, %p1268_p0 }
  0x5c   : > { %p1271_p6 = pnand %p1270_p1, %p1264_p8 }
  0x5e   : > { %1274 = shalt.err (!%p1271_p6)
}
  0x5f   : > { %s1374_s12 = smov 512   ;;  %s1375_s14 = smov 256  }
  0x60   : > { %s1376_s22 = smov 16   ;;  %226 = sbr.rel (%p1470_p12) target bundleno = 790 (0x316), region = 36 }
  0x61   : > { %1040 = dma.hbm_to_vmem [thread:$0]  (!%p1488_p4), %s1555_s30, 1024, %s1559_s7, %s1566_s9, %s1374_s12, %s1375_s14, %s1376_s22  }
  0x62   : > { %p1871_p9 = scmp.eq.s32.totalorder (!%p1470_p12), %s1439_s21, 0 }
  0x67   : > { %1328 = dma.done.wait (%p1871_p9), [#allocation4], 512   ;;  %p1872_p13 = pmov %p1871_p9 }
  0x68   : > { %p1873_p11 = pmov %p1871_p9 }
  0x69   : > { %1330 = vsyncadd (%p1872_p13), [#allocation4], 4294966784 }
  0x6a   : > { %1332 = dma.done.wait (%p1873_p11), [#allocation7], 64   ;;  %p1874_p3 = pmov %p1871_p9 }
  0x6b   : > { %s236_s8 = sand.u32 1, %s1439_s21   ;;  %s1606_s30 = sand.u32 1, %s1349_s16  }
  0x6c   : > { %1334 = vsyncadd (%p1874_p3), [#allocation7], 4294967232  ;;  %s989_s28 = sshll.u32 %s1606_s30, 6  ;;  %s237_s7 = scalar_lea.sflag [#allocation4], %s236_s8 }
  0x6d   : > { %s1609_s9 = scalar_lea.vmem [#allocation8], %s989_s28  ;;  %p1875_p12 = scmp.ne.s32.totalorder %s1864_s25, 0 }
  0x6f   : > { %1336 = dma.done.wait (%p1875_p12), %s237_s7, 1024  }
  0x70   : > { %1338 = vsyncadd (%p1875_p12), %s237_s7, 4294966272  ;;  %s990_s24 = sshll.u32 %s1606_s30, 7  ;;  %p991_p4 = scmp.ne.s32.totalorder %s1357_s18, 0 }
  0x71   : > { %s1616_s5 = scalar_lea.vmem [#allocation9], %s990_s24  ;;  %v1619_v0 = vld [vmem:[#allocation3 + $0x10] sm:$0xff] (!%p991_p4)  ;;  %v1621_v1 = vld [vmem:[#allocation6 + $0x2] ss:$0 sm:$0xff] (!%p991_p4)  ;;  %vm318_vm0 = vcmask (!%p991_p4), 261120   ;;  %v1629_v5 = vld [vmem:[#allocation3 + $0x18] sm:$0xff] (!%p991_p4)  ;;  %v295_v7 = vlaneseq (!%p991_p4) }
  0x72   : > { %273 = sbr.rel (%p991_p4) target bundleno = 541 (0x21d), region = 52  ;;  %v1623_v2 = vld [vmem:[#allocation3] sm:$0xff] (!%p991_p4)  ;;  %v316_v3 = vmul.f32 (!%p991_p4), %v1621_v1, %v1619_v0  ;;  %v1631_v6 = vld [vmem:[#allocation3 + $0x8] sm:$0xff] (!%p991_p4)  ;;  %v317_v9 = vmul.f32 (!%p991_p4), %v1621_v1, %v1629_v5  ;;  %v1377_v12 = vmov (!%p991_p4), 1966171168  }
  0x73   : > { %v1627_v4 = vld [vmem:[#allocation6] ss:$0 sm:$0xff] (!%p991_p4)  ;;  %v1639_v11 = vld [vmem:[#allocation6 + $0x1] ss:$0 sm:$0xff] (!%p991_p4)  ;;  %v293_v13 = vunpack.c.l.s4 (!%p991_p4), %v1377_v12  ;;  %v1652_v22 = vld [vmem:[#allocation6 + $0x3] ss:$0 sm:$0xff] (!%p991_p4) }
  0x74   : > { %v314_v8 = vmul.f32 (!%p991_p4), %v1627_v4, %v1623_v2  ;;  %v315_v10 = vmul.f32 (!%p991_p4), %v1627_v4, %v1631_v6  ;;  %v325_v14 = vsel (!%p991_p4), %vm318_vm0, %v316_v3, 0.0  ;;  %v328_v16 = vsel (!%p991_p4), %vm318_vm0, %v317_v9, 0.0  ;;  %v992_v18 = vld.sshfl [vmem:[%s1857_s2] sm:$0x11 pattern:$0x75316420] (!%p991_p4) }
  0x75   : > { %326 = vadd.xlane.f32.xlu1 (!%p991_p4), %v325_v14  ;;  %v344_v17 = vmul.f32 (!%p991_p4), %v1639_v11, %v1631_v6  ;;  %v294_v19 = vunpack.c.0.s8 (!%p991_p4), %v293_v13  ;;  %v343_v21 = vmul.f32 (!%p991_p4), %v1639_v11, %v1623_v2  ;;  %v296_v23 = vshrl.u32 (!%p991_p4), %v295_v7, 7 }
  0x76   : > { %v319_v15 = vsel (!%p991_p4), %vm318_vm0, %v314_v8, 0.0  ;;  %v322_v20 = vsel (!%p991_p4), %vm318_vm0, %v315_v10, 0.0  ;;  %v291_v24 = vcombine.high (!%p991_p4), %v992_v18, %v992_v18  ;;  %v346_v28 = vmul.f32 (!%p991_p4), %v1652_v22, %v1629_v5 }
  0x77   : > { %320 = vadd.xlane.f32.xlu0 (!%p991_p4), %v319_v15  ;;  %v1654_v25 = vsub.s32 (!%p991_p4), %v294_v19, %v296_v23  ;;  %v1656_v26 = vsub.s32 (!%p991_p4), 0, %v296_v23  ;;  %v350_v27 = vsel (!%p991_p4), %vm318_vm0, %v344_v17, 0.0  ;;  %v347_v29 = vsel (!%p991_p4), %vm318_vm0, %v343_v21, 0.0 }
  0x78   : > { %v345_v30 = vmul.f32 (!%p991_p4), %v1652_v22, %v1619_v0  ;;  %v356_v34 = vsel (!%p991_p4), %vm318_vm0, %v346_v28, 0.0 }
  0x79   : > { %329 = vadd.xlane.f32.xlu1 %v328_v16  ;;  %v298_v31 = vrot.slane %v992_v18, %v1654_v25  ;;  %v305_v32 = vrot.slane %v291_v24, %v1654_v25 }
  0x7a   : > { %v353_v36 = vsel %vm318_vm0, %v345_v30, 0.0 }
  0x7b   : > { %323 = vadd.xlane.f32.xlu0 %v322_v20  ;;  %v1667_v33 = vrot.slane %v298_v31, %v1656_v26  ;;  %v1671_v35 = vrot.slane %v305_v32, %v1656_v26 }
  0x7d   : > { %351 = vadd.xlane.f32.xlu1 %v350_v27  ;;  %v374_v37 = vmul.f32 %v1667_v33, %v1631_v6  ;;  %v373_v38 = vmul.f32 %v1667_v33, %v1623_v2  ;;  %v376_v40 = vmul.f32 %v1671_v35, %v1629_v5  ;;  %v375_v42 = vmul.f32 %v1671_v35, %v1619_v0 }
  0x7f   : > { %348 = vadd.xlane.f32.xlu0 %v347_v29  ;;  %v380_v39 = vsel %vm318_vm0, %v374_v37, 0.0  ;;  %v377_v41 = vsel %vm318_vm0, %v373_v38, 0.0  ;;  %v386_v43 = vsel %vm318_vm0, %v376_v40, 0.0  ;;  %v383_v44 = vsel %vm318_vm0, %v375_v42, 0.0 }
  0x81   : > { %357 = vadd.xlane.f32.xlu1 %v356_v34 }
  0x83   : > { %354 = vadd.xlane.f32.xlu0 %v353_v36 }
  0x85   : > { %381 = vadd.xlane.f32.xlu1 %v380_v39 }
  0x87   : > { %378 = vadd.xlane.f32.xlu0 %v377_v41 }
  0x89   : > { %387 = vadd.xlane.f32.xlu1 %v386_v43 }
  0x8b   : > { %384 = vadd.xlane.f32.xlu0 %v383_v44 }
 0x102   : > { %v327_v45 = vpop.xlane.xlu1 %326 }
 0x103   : > { %v333_v63 = vmul.f32 0.17677669, %v327_v45 }
 0x104   : > { %v321_v46 = vpop.xlane.xlu0 %320 }
 0x105   : > { %v331_v56 = vmul.f32 0.17677669, %v321_v46 }
 0x106   : > { %v330_v47 = vpop.xlane.xlu1 %329 }
 0x107   : > { %v334_v3 = vmul.f32 0.17677669, %v330_v47 }
 0x108   : > { %v324_v48 = vpop.xlane.xlu0 %323 }
 0x109   : > { %v332_v55 = vmul.f32 0.17677669, %v324_v48 }
 0x10a   : > { %v352_v49 = vpop.xlane.xlu1 %351 }
 0x10b   : > { %v360_v52 = vmul.f32 0.17677669, %v352_v49 }
 0x10c   : > { %v349_v50 = vpop.xlane.xlu0 %348 }
 0x10d   : > { %v359_v54 = vmul.f32 0.17677669, %v349_v50  ;;  %v394_v60 = vmax.f32 %v332_v55, %v360_v52 }
 0x10e   : > { %v358_v51 = vpop.xlane.xlu1 %357 }
 0x10f   : > { %v362_v57 = vmul.f32 0.17677669, %v358_v51  ;;  %v393_v7 = vmax.f32 %v331_v56, %v359_v54 }
 0x110   : > { %v355_v53 = vpop.xlane.xlu0 %354 }
 0x111   : > { %v361_v58 = vmul.f32 0.17677669, %v355_v53  ;;  %v396_v10 = vmax.f32 %v334_v3, %v362_v57 }
 0x112   : > { %v382_v59 = vpop.xlane.xlu1 %381 }
 0x113   : > { %v390_v61 = vmul.f32 0.17677669, %v382_v59  ;;  %v395_v12 = vmax.f32 %v333_v63, %v361_v58 }
 0x114   : > { %v379_v62 = vpop.xlane.xlu0 %378 }
 0x115   : > { %v389_v8 = vmul.f32 0.17677669, %v379_v62  ;;  %v398_v9 = vmax.f32 %v394_v60, %v390_v61 }
 0x116   : > { %v388_v14 = vpop.xlane.xlu1 %387 }
 0x117   : > { %v397_v13 = vmax.f32 %v393_v7, %v389_v8  ;;  %v402_v15 = vsub.f32 %v332_v55, %v398_v9  ;;  %v414_v16 = vsub.f32 %v360_v52, %v398_v9  ;;  %v426_v17 = vsub.f32 %v390_v61, %v398_v9 }
 0x118   : > { %v392_v18 = vmul.f32 0.17677669, %v388_v14  ;;  %v385_v19 = vpop.xlane.xlu0 %384 }
 0x119   : > { %v401_v20 = vsub.f32 %v331_v56, %v397_v13  ;;  %v413_v21 = vsub.f32 %v359_v54, %v397_v13  ;;  %v425_v23 = vsub.f32 %v389_v8, %v397_v13  ;;  %v391_v24 = vmul.f32 0.17677669, %v385_v19 }
 0x11a   : > { %v407_v27 = vmul.f32 1.442695, %v402_v15  ;;  %v419_v28 = vmul.f32 1.442695, %v414_v16  ;;  %v431_v29 = vmul.f32 1.442695, %v426_v17  ;;  %v400_v30 = vmax.f32 %v396_v10, %v392_v18 }
 0x11b   : > { %v405_v31 = vmul.f32 1.442695, %v401_v20  ;;  %v417_v32 = vmul.f32 1.442695, %v413_v21  ;;  %v399_v34 = vmax.f32 %v395_v12, %v391_v24  ;;  %v429_v39 = vmul.f32 1.442695, %v425_v23 }
 0x11c   : > { %1113 = vpow2.f32 %v407_v27  ;;  %v404_v36 = vsub.f32 %v334_v3, %v400_v30  ;;  %v416_v37 = vsub.f32 %v362_v57, %v400_v30  ;;  %v428_v38 = vsub.f32 %v392_v18, %v400_v30 }
 0x11d   : > { %1115 = vpow2.f32 %v419_v28  ;;  %v403_v40 = vsub.f32 %v333_v63, %v399_v34  ;;  %v415_v42 = vsub.f32 %v361_v58, %v399_v34  ;;  %v427_v45 = vsub.f32 %v391_v24, %v399_v34 }
 0x11e   : > { %1117 = vpow2.f32 %v431_v29  ;;  %v411_v41 = vmul.f32 1.442695, %v404_v36  ;;  %v423_v43 = vmul.f32 1.442695, %v416_v37  ;;  %v435_v44 = vmul.f32 1.442695, %v428_v38 }
 0x11f   : > { %1119 = vpow2.f32 %v405_v31  ;;  %v409_v46 = vmul.f32 1.442695, %v403_v40  ;;  %v421_v47 = vmul.f32 1.442695, %v415_v42  ;;  %v433_v48 = vmul.f32 1.442695, %v427_v45 }
 0x120   : > { %1121 = vpow2.f32 %v417_v32 }
 0x121   : > { %1123 = vpow2.f32 %v429_v39 }
 0x122   : > { %1125 = vpow2.f32 %v411_v41 }
 0x123   : > { %1127 = vpow2.f32 %v423_v43 }
 0x124   : > { %1129 = vpow2.f32 %v435_v44 }
 0x125   : > { %1131 = vpow2.f32 %v409_v46 }
 0x126   : > { %v1114_v49 = vpop.eup %1113  ;;  %1133 = vpow2.f32 %v421_v47 }
 0x127   : > { %v1116_v50 = vpop.eup %1115  ;;  %1135 = vpow2.f32 %v433_v48 }
 0x128   : > { %v1118_v51 = vpop.eup %1117  ;;  %v438_v52 = vadd.f32 %v1116_v50, %v1114_v49 }
 0x129   : > { %v1120_v53 = vpop.eup %1119 }
 0x12a   : > { %v1122_v54 = vpop.eup %1121  ;;  %v442_v55 = vadd.f32 %v1118_v51, %v438_v52 }
 0x12b   : > { %v1124_v56 = vpop.eup %1123  ;;  %v437_v57 = vadd.f32 %v1122_v54, %v1120_v53 }
 0x12c   : > { %v1126_v58 = vpop.eup %1125  ;;  %1137 = vrcp.f32 %v442_v55 }
 0x12d   : > { %v1128_v59 = vpop.eup %1127  ;;  %v441_v60 = vadd.f32 %v1124_v56, %v437_v57  ;;  %v998_v57 = vld.sshfl [vmem:[%s1857_s2 + $0x2] sm:$0x11 pattern:$0x75316420] }
 0x12e   : > { %v1130_v61 = vpop.eup %1129  ;;  %v440_v62 = vadd.f32 %v1128_v59, %v1126_v58 }
 0x12f   : > { %v1132_v63 = vpop.eup %1131  ;;  %1139 = vrcp.f32 %v441_v60 }
 0x130   : > { %v1134_v3 = vpop.eup %1133  ;;  %v444_v7 = vadd.f32 %v1130_v61, %v440_v62 }
 0x131   : > { %v439_v8 = vadd.f32 %v1134_v3, %v1132_v63  ;;  %v1136_v9 = vpop.eup %1135 }
 0x132   : > { %1141 = vrcp.f32 %v444_v7 }
 0x133   : > { %v443_v10 = vadd.f32 %v1136_v9, %v439_v8 }
 0x135   : > { %1143 = vrcp.f32 %v443_v10 }
 0x136   : > { %v1138_v12 = vpop.eup %1137 }
 0x137   : > { %v470_v13 = vmul.f32 %v1138_v12, %v1118_v51  ;;  %v450_v14 = vmul.f32 %v1138_v12, %v1114_v49  ;;  %v458_v15 = vmul.f32 %v1138_v12, %v1116_v50 }
 0x139   : > { %v1140_v16 = vpop.eup %1139  ;;  %v454_v17 = vmul.f32 %v1627_v4, %v450_v14  ;;  %v462_v18 = vmul.f32 %v1639_v11, %v458_v15  ;;  %v474_v24 = vmul.f32 %v470_v13, %v1667_v33 }
 0x13a   : > { %v469_v19 = vmul.f32 %v1140_v16, %v1124_v56  ;;  %v449_v20 = vmul.f32 %v1140_v16, %v1120_v53  ;;  %v457_v21 = vmul.f32 %v1140_v16, %v1122_v54 }
 0x13b   : > { %v466_v23 = vadd.f32 %v462_v18, %v454_v17 }
 0x13c   : > { %v1142_v27 = vpop.eup %1141  ;;  %v453_v28 = vmul.f32 %v1627_v4, %v449_v20  ;;  %v461_v29 = vmul.f32 %v1639_v11, %v457_v21  ;;  %v473_v37 = vmul.f32 %v469_v19, %v1667_v33 }
 0x13d   : > { %v472_v30 = vmul.f32 %v1142_v27, %v1130_v61  ;;  %v478_v31 = vadd.f32 %v474_v24, %v466_v23  ;;  %v452_v32 = vmul.f32 %v1142_v27, %v1126_v58  ;;  %v460_v34 = vmul.f32 %v1142_v27, %v1128_v59 }
 0x13e   : > { %v465_v36 = vadd.f32 %v461_v29, %v453_v28  ;;  %v495_v61 = vcombine.high %v998_v57, %v998_v57 }
 0x13f   : > { %v1144_v38 = vpop.eup %1143  ;;  %v1693_v39 = vadd.f32 %v478_v31, %v1631_v6  ;;  %v456_v40 = vmul.f32 %v1621_v1, %v452_v32  ;;  %v464_v41 = vmul.f32 %v1652_v22, %v460_v34  ;;  %v476_v48 = vmul.f32 %v472_v30, %v1671_v35 }
 0x140   : > { %v471_v42 = vmul.f32 %v1144_v38, %v1136_v9  ;;  %v477_v43 = vadd.f32 %v473_v37, %v465_v36  ;;  %v451_v44 = vmul.f32 %v1144_v38, %v1132_v63  ;;  %v459_v45 = vmul.f32 %v1144_v38, %v1134_v3 }
 0x141   : > { %v511_v46 = vmul.f32 %v1627_v4, %v1693_v39  ;;  %v468_v47 = vadd.f32 %v464_v41, %v456_v40  ;;  %v509_v9 = vrot.slane %v495_v61, %v1654_v25 }
 0x142   : > { %v1701_v33 = vadd.f32 %v477_v43, %v1623_v2  ;;  %v455_v6 = vmul.f32 %v1621_v1, %v451_v44  ;;  %v463_v49 = vmul.f32 %v1652_v22, %v459_v45  ;;  %v475_v54 = vmul.f32 %v471_v42, %v1671_v35 }
 0x143   : > { %v517_v50 = vsel %vm318_vm0, %v511_v46, 0.0  ;;  %v480_v51 = vadd.f32 %v476_v48, %v468_v47  ;;  %v502_v35 = vrot.slane %v998_v57, %v1654_v25  ;;  %v1744_v15 = vrot.slane %v509_v9, %v1656_v26 }
 0x144   : > { %518 = vadd.xlane.f32.xlu1 %v517_v50  ;;  %v510_v52 = vmul.f32 %v1627_v4, %v1701_v33  ;;  %v467_v53 = vadd.f32 %v463_v49, %v455_v6  ;;  %v530_v3 = vmul.f32 %v1639_v11, %v1701_v33 }
 0x145   : > { %v1710_v55 = vadd.f32 %v480_v51, %v1629_v5  ;;  %v531_v5 = vmul.f32 %v1639_v11, %v1693_v39  ;;  %v1734_v8 = vrot.slane %v502_v35, %v1656_v26 }
 0x146   : > { %v514_v2 = vsel %vm318_vm0, %v510_v52, 0.0  ;;  %v479_v56 = vadd.f32 %v475_v54, %v467_v53  ;;  %v534_v10 = vsel %vm318_vm0, %v530_v3, 0.0 }
 0x147   : > { %515 = vadd.xlane.f32.xlu0 %v514_v2  ;;  %v513_v58 = vmul.f32 %v1621_v1, %v1710_v55  ;;  %v533_v7 = vmul.f32 %v1652_v22, %v1710_v55  ;;  %v561_v14 = vmul.f32 %v1734_v8, %v1693_v39  ;;  %v560_v25 = vmul.f32 %v1734_v8, %v1701_v33 }
 0x148   : > { %v1719_v59 = vadd.f32 %v479_v56, %v1619_v0  ;;  %v537_v0 = vsel %vm318_vm0, %v531_v5, 0.0  ;;  %v563_v18 = vmul.f32 %v1744_v15, %v1710_v55 }
 0x149   : > { %v523_v60 = vsel %vm318_vm0, %v513_v58, 0.0  ;;  %v543_v13 = vsel %vm318_vm0, %v533_v7, 0.0  ;;  %v567_v17 = vsel %vm318_vm0, %v561_v14, 0.0  ;;  %v564_v19 = vsel %vm318_vm0, %v560_v25, 0.0 }
 0x14a   : > { %524 = vadd.xlane.f32.xlu1 %v523_v60  ;;  %v512_v62 = vmul.f32 %v1621_v1, %v1719_v59  ;;  %v532_v12 = vmul.f32 %v1652_v22, %v1719_v59  ;;  %v562_v20 = vmul.f32 %v1744_v15, %v1719_v59  ;;  %v573_v26 = vsel %vm318_vm0, %v563_v18, 0.0 }
 0x14c   : > { %v520_v63 = vsel %vm318_vm0, %v512_v62, 0.0  ;;  %v540_v16 = vsel %vm318_vm0, %v532_v12, 0.0  ;;  %v570_v21 = vsel %vm318_vm0, %v562_v20, 0.0 }
 0x14d   : > { %521 = vadd.xlane.f32.xlu0 %v520_v63 }
 0x14e   : > { %538 = vadd.xlane.f32.xlu1 %v537_v0 }
 0x151   : > { %535 = vadd.xlane.f32.xlu0 %v534_v10 }
 0x152   : > { %544 = vadd.xlane.f32.xlu1 %v543_v13 }
 0x155   : > { %541 = vadd.xlane.f32.xlu0 %v540_v16 }
 0x156   : > { %568 = vadd.xlane.f32.xlu1 %v567_v17 }
 0x159   : > { %565 = vadd.xlane.f32.xlu0 %v564_v19 }
 0x15a   : > { %574 = vadd.xlane.f32.xlu1 %v573_v26 }
 0x15d   : > { %571 = vadd.xlane.f32.xlu0 %v570_v21 }
 0x1d1   : > { %v519_v23 = vpop.xlane.xlu1 %518 }
 0x1d2   : > { %v527_v34 = vmul.f32 0.17677669, %v519_v23 }
 0x1d4   : > { %v516_v24 = vpop.xlane.xlu0 %515 }
 0x1d5   : > { %v526_v43 = vmul.f32 0.17677669, %v516_v24 }
 0x1d7   : > { %v525_v27 = vpop.xlane.xlu1 %524 }
 0x1d8   : > { %v529_v44 = vmul.f32 0.17677669, %v525_v27 }
 0x1da   : > { %v522_v28 = vpop.xlane.xlu0 %521 }
 0x1db   : > { %v539_v29 = vpop.xlane.xlu1 %538  ;;  %v528_v48 = vmul.f32 0.17677669, %v522_v28 }
 0x1dc   : > { %v547_v32 = vmul.f32 0.17677669, %v539_v29 }
 0x1de   : > { %v536_v30 = vpop.xlane.xlu0 %535  ;;  %v581_v41 = vmax.f32 %v527_v34, %v547_v32 }
 0x1df   : > { %v545_v31 = vpop.xlane.xlu1 %544  ;;  %v546_v37 = vmul.f32 0.17677669, %v536_v30 }
 0x1e0   : > { %v549_v38 = vmul.f32 0.17677669, %v545_v31 }
 0x1e1   : > { %v580_v6 = vmax.f32 %v526_v43, %v546_v37 }
 0x1e2   : > { %v542_v36 = vpop.xlane.xlu0 %541  ;;  %v583_v49 = vmax.f32 %v529_v44, %v549_v38 }
 0x1e3   : > { %v569_v40 = vpop.xlane.xlu1 %568  ;;  %v548_v45 = vmul.f32 0.17677669, %v542_v36 }
 0x1e4   : > { %v577_v42 = vmul.f32 0.17677669, %v569_v40 }
 0x1e5   : > { %v582_v56 = vmax.f32 %v528_v48, %v548_v45 }
 0x1e6   : > { %v585_v46 = vmax.f32 %v581_v41, %v577_v42  ;;  %v566_v47 = vpop.xlane.xlu0 %565 }
 0x1e7   : > { %v576_v50 = vmul.f32 0.17677669, %v566_v47  ;;  %v575_v51 = vpop.xlane.xlu1 %574 }
 0x1e8   : > { %v589_v52 = vsub.f32 %v527_v34, %v585_v46  ;;  %v601_v53 = vsub.f32 %v547_v32, %v585_v46  ;;  %v613_v54 = vsub.f32 %v577_v42, %v585_v46  ;;  %v579_v2 = vmul.f32 0.17677669, %v575_v51 }
 0x1e9   : > { %v584_v57 = vmax.f32 %v580_v6, %v576_v50 }
 0x1ea   : > { %v594_v58 = vmul.f32 1.442695, %v589_v52  ;;  %v606_v60 = vmul.f32 1.442695, %v601_v53  ;;  %v618_v5 = vmul.f32 1.442695, %v613_v54  ;;  %v587_v35 = vmax.f32 %v583_v49, %v579_v2  ;;  %v572_v61 = vpop.xlane.xlu0 %571 }
 0x1eb   : > { %v588_v62 = vsub.f32 %v526_v43, %v584_v57  ;;  %v600_v63 = vsub.f32 %v546_v37, %v584_v57  ;;  %v612_v3 = vsub.f32 %v576_v50, %v584_v57  ;;  %v578_v0 = vmul.f32 0.17677669, %v572_v61 }
 0x1ec   : > { %1145 = vpow2.f32 %v594_v58  ;;  %v591_v7 = vsub.f32 %v529_v44, %v587_v35  ;;  %v603_v9 = vsub.f32 %v549_v38, %v587_v35  ;;  %v615_v10 = vsub.f32 %v579_v2, %v587_v35 }
 0x1ed   : > { %1147 = vpow2.f32 %v606_v60  ;;  %v592_v12 = vmul.f32 1.442695, %v588_v62  ;;  %v604_v13 = vmul.f32 1.442695, %v600_v63  ;;  %v616_v14 = vmul.f32 1.442695, %v612_v3 }
 0x1ee   : > { %1149 = vpow2.f32 %v618_v5  ;;  %v598_v16 = vmul.f32 1.442695, %v591_v7  ;;  %v610_v25 = vmul.f32 1.442695, %v603_v9  ;;  %v586_v17 = vmax.f32 %v582_v56, %v578_v0 }
 0x1ef   : > { %1151 = vpow2.f32 %v592_v12  ;;  %v622_v18 = vmul.f32 1.442695, %v615_v10 }
 0x1f0   : > { %1153 = vpow2.f32 %v604_v13  ;;  %v590_v19 = vsub.f32 %v528_v48, %v586_v17  ;;  %v602_v20 = vsub.f32 %v548_v45, %v586_v17  ;;  %v614_v26 = vsub.f32 %v578_v0, %v586_v17 }
 0x1f1   : > { %1155 = vpow2.f32 %v616_v14 }
 0x1f2   : > { %1157 = vpow2.f32 %v598_v16  ;;  %v596_v21 = vmul.f32 1.442695, %v590_v19  ;;  %v608_v23 = vmul.f32 1.442695, %v602_v20  ;;  %v620_v24 = vmul.f32 1.442695, %v614_v26 }
 0x1f3   : > { %1159 = vpow2.f32 %v610_v25 }
 0x1f4   : > { %1161 = vpow2.f32 %v622_v18 }
 0x1f5   : > { %1163 = vpow2.f32 %v596_v21 }
 0x1f6   : > { %v1146_v27 = vpop.eup %1145  ;;  %1165 = vpow2.f32 %v608_v23 }
 0x1f7   : > { %v1148_v28 = vpop.eup %1147  ;;  %1167 = vpow2.f32 %v620_v24 }
 0x1f8   : > { %v1150_v29 = vpop.eup %1149  ;;  %v625_v30 = vadd.f32 %v1148_v28, %v1146_v27 }
 0x1f9   : > { %v1152_v31 = vpop.eup %1151 }
 0x1fa   : > { %v1154_v32 = vpop.eup %1153  ;;  %v629_v34 = vadd.f32 %v1150_v29, %v625_v30 }
 0x1fb   : > { %v1156_v36 = vpop.eup %1155  ;;  %v624_v37 = vadd.f32 %v1154_v32, %v1152_v31 }
 0x1fc   : > { %v1158_v38 = vpop.eup %1157  ;;  %1169 = vrcp.f32 %v629_v34 }
 0x1fd   : > { %v1160_v40 = vpop.eup %1159  ;;  %v628_v41 = vadd.f32 %v1156_v36, %v624_v37 }
 0x1fe   : > { %v1162_v42 = vpop.eup %1161  ;;  %v627_v43 = vadd.f32 %v1160_v40, %v1158_v38 }
 0x1ff   : > { %v1164_v44 = vpop.eup %1163  ;;  %1171 = vrcp.f32 %v628_v41 }
 0x200   : > { %v1166_v45 = vpop.eup %1165  ;;  %v631_v46 = vadd.f32 %v1162_v42, %v627_v43 }
 0x201   : > { %v626_v47 = vadd.f32 %v1166_v45, %v1164_v44  ;;  %v1168_v48 = vpop.eup %1167 }
 0x202   : > { %1173 = vrcp.f32 %v631_v46 }
 0x203   : > { %v630_v6 = vadd.f32 %v1168_v48, %v626_v47 }
 0x205   : > { %1175 = vrcp.f32 %v630_v6 }
 0x206   : > { %v1170_v49 = vpop.eup %1169 }
 0x207   : > { %v637_v50 = vmul.f32 %v1170_v49, %v1146_v27  ;;  %v645_v51 = vmul.f32 %v1170_v49, %v1148_v28  ;;  %v657_v52 = vmul.f32 %v1170_v49, %v1150_v29 }
 0x209   : > { %v1172_v53 = vpop.eup %1171  ;;  %v641_v54 = vmul.f32 %v1627_v4, %v637_v50  ;;  %v649_v2 = vmul.f32 %v1639_v11, %v645_v51  ;;  %v661_v5 = vmul.f32 %v657_v52, %v1734_v8 }
 0x20a   : > { %v636_v56 = vmul.f32 %v1172_v53, %v1152_v31  ;;  %v644_v57 = vmul.f32 %v1172_v53, %v1154_v32  ;;  %v656_v58 = vmul.f32 %v1172_v53, %v1156_v36 }
 0x20b   : > { %v653_v60 = vadd.f32 %v649_v2, %v641_v54 }
 0x20c   : > { %v1174_v35 = vpop.eup %1173  ;;  %v640_v61 = vmul.f32 %v1627_v4, %v636_v56  ;;  %v648_v62 = vmul.f32 %v1639_v11, %v644_v57  ;;  %v660_v10 = vmul.f32 %v656_v58, %v1734_v8 }
 0x20d   : > { %v665_v63 = vadd.f32 %v661_v5, %v653_v60  ;;  %v639_v3 = vmul.f32 %v1174_v35, %v1158_v38  ;;  %v647_v0 = vmul.f32 %v1174_v35, %v1160_v40  ;;  %v659_v7 = vmul.f32 %v1174_v35, %v1162_v42 }
 0x20e   : > { %v652_v9 = vadd.f32 %v648_v62, %v640_v61 }
 0x20f   : > { %v1176_v12 = vpop.eup %1175  ;;  %v669_v13 = vadd.f32 %v665_v63, %v1693_v39  ;;  %v643_v14 = vmul.f32 %v1621_v1, %v639_v3  ;;  %v651_v16 = vmul.f32 %v1652_v22, %v647_v0  ;;  %v663_v11 = vmul.f32 %v659_v7, %v1744_v15 }
 0x210   : > { %v664_v25 = vadd.f32 %v660_v10, %v652_v9  ;;  %v638_v17 = vmul.f32 %v1176_v12, %v1164_v44  ;;  %v646_v18 = vmul.f32 %v1176_v12, %v1166_v45  ;;  %v658_v4 = vmul.f32 %v1176_v12, %v1168_v48 }
 0x211   : > { %v655_v19 = vadd.f32 %v651_v16, %v643_v14 }
 0x212   : > { %v668_v20 = vadd.f32 %v664_v25, %v1701_v33  ;;  %v642_v26 = vmul.f32 %v1621_v1, %v638_v17  ;;  %v650_v8 = vmul.f32 %v1652_v22, %v646_v18  ;;  %v662_v24 = vmul.f32 %v658_v4, %v1744_v15 }
 0x213   : > { %v667_v21 = vadd.f32 %v663_v11, %v655_v19 }
 0x214   : > { %v672_v23 = vpack.c.bf16 %v669_v13, %v668_v20  ;;  %v654_v39 = vadd.f32 %v650_v8, %v642_v26 }
 0x215   : > { %v671_v27 = vadd.f32 %v667_v21, %v1710_v55 }
 0x216   : > { %674 = vst.msk [vmem:[#allocation2] sm:$0xff] %vm318_vm0, %v672_v23  ;;  %v666_v28 = vadd.f32 %v662_v24, %v654_v39 }
 0x218   : > { %v670_v29 = vadd.f32 %v666_v28, %v1719_v59 }
 0x21a   : > { %v673_v30 = vpack.c.bf16 %v671_v27, %v670_v29 }
 0x21c   : > { %675 = vst.msk [vmem:[#allocation2 + $0x8] sm:$0xff] %vm318_vm0, %v673_v30 }
 0x21d PF: > { %v1177_v1 = vld [vmem:[%s1609_s9 + $0x4] ss:$16 sps:$4 sm:$0xff]   ;;  %v1179_v22 = vld [vmem:[%s1609_s9 + $0xc] ss:$16 sps:$4 sm:$0xff]   ;;  %v1378_v33 = vmov 0   ;;  %vm726_vm1 = vcmask 261120  }
 0x21e   : > { %765 = vmatprep.mubr.bf16.mxu0 %v1378_v33  ;;  %818 = vmatprep.mubr.bf16.mxu1 %v1378_v33  ;;  %v1181_v55 = vld [vmem:[%s1609_s9] ss:$16 sps:$4 sm:$0xff]   ;;  %v1182_v59 = vld [vmem:[%s1609_s9 + $0x8] ss:$16 sps:$4 sm:$0xff]   ;;  %v1183_v15 = vld [vmem:[%s1609_s9 + $0x24] ss:$16 sps:$4 sm:$0xff]  }
 0x21f   : > { %733 = vmatprep.subr.bf16.mxu0 %v1177_v1  ;;  %786 = vmatprep.subr.bf16.mxu1 %v1179_v22  ;;  %v1185_v31 = vld [vmem:[%s1609_s9 + $0x2c] ss:$16 sps:$4 sm:$0xff]   ;;  %v1187_v32 = vld [vmem:[%s1609_s9 + $0x20] ss:$16 sps:$4 sm:$0xff]   ;;  %v1188_v34 = vld [vmem:[%s1609_s9 + $0x28] ss:$16 sps:$4 sm:$0xff]  }
 0x220   : > { %734 = vmatpush1.bf16.msra.mxu0 %v1181_v55  ;;  %787 = vmatpush1.bf16.msra.mxu1 %v1182_v59  ;;  %v676_v36 = vld [vmem:[#allocation2] sm:$0xff]  ;;  %s1017_s29 = sshll.u32 %s1357_s18, 9  ;;  %s872_s13 = sshll.u32 %s1616_s5, 4  ;;  %s1800_s13 = int_to_ptr.vmem [resolvable:$true] %s872_s13 }
 0x221   : > { %735 = vmatprep.subr.bf16.mxu0 %v1183_v15  ;;  %788 = vmatprep.subr.bf16.mxu1 %v1185_v31  ;;  %s1796_s22 = scalar_lea.hbm %s1859_s4, %s1017_s29  ;;  %s856_s18 = scalar_lea.sflag [#allocation5], %s1606_s30 }
 0x222   : > { %s1275_s8 = scalar_lea.vmem %s1800_s13, 2048  ;;  %p1876_p10 = scmp.ne.s32.totalorder %s1865_s26, 0 }
 0x223   : > { %v677_v37 = vld [vmem:[#allocation2 + $0x8] sm:$0xff]  ;;  %p1276_p7 = scmp.ne.s32.totalorder %s1800_s13, %s1275_s8  ;;  %s1379_s28 = smov [#allocation9]  }
 0x224   : > { %736 = vmatpush1.bf16.msra.mxu0 %v1187_v32  ;;  %789 = vmatpush1.bf16.msra.mxu1 %v1188_v34  ;;  %s1279_s7 = sshll.u32 %s1379_s28, 4  ;;  %s1280_s7 = int_to_ptr.vmem [resolvable:$false] %s1279_s7 }
 0x225   : > { %p1277_p2 = pnand %p1276_p7, %p1876_p10  ;;  %s1281_s9 = scalar_lea.vmem %s1280_s7, 4096 }
 0x226   : > { %p1282_p0 = scmp.lt.s32.totalorder %s1800_s13, %s1280_s7  ;;  %p1283_p5 = scmp.lt.s32.totalorder %s1281_s9, %s1275_s8 }
 0x227   : > { %1007 = vmatmul.mubr.msk.bf16.vlgmr.msra.gmra.mrb[0].mxu0 %vm726_vm1, %v676_v36  ;;  %1009 = vmatmul.mubr.msk.bf16.vlgmr.msra.gmra.mrb[0].mxu1 %vm726_vm1, %v676_v36  ;;  %p1278_p8 = pneg %p1277_p2 }
 0x228   : > { %775 = vmatprep.mubr.bf16.mxu0 %v1378_v33  ;;  %828 = vmatprep.mubr.bf16.mxu1 %v1378_v33  ;;  %p1284_p1 = por %p1283_p5, %p1282_p0 }
 0x22a   : > { %p1285_p6 = pnand %p1284_p1, %p1278_p8 }
 0x22f   : > { %1008 = vmatmul.mubr.msk.bf16.gmra.mrb[4].mxu0 %vm726_vm1, %v677_v37  ;;  %1010 = vmatmul.mubr.msk.bf16.gmra.mrb[4].mxu1 %vm726_vm1, %v677_v37 }
 0x2fa   : > { %v767_v38 = vpop.f32.mrb[0].mxu0  ;;  %v820_v40 = vpop.f32.mrb[0].mxu1 }
 0x2fb   : > { %839 = vst [vmem:[%s1616_s5] sm:$0xff] %v767_v38  ;;  %841 = vst [vmem:[%s1616_s5 + $0x10] sm:$0xff] %v820_v40  ;;  %v769_v41 = vpop.f32.mrb[1].mxu0  ;;  %v822_v42 = vpop.f32.mrb[1].mxu1 }
 0x2fc   : > { %840 = vst [vmem:[%s1616_s5 + $0x8] sm:$0xff] %v769_v41  ;;  %842 = vst [vmem:[%s1616_s5 + $0x18] sm:$0xff] %v822_v42  ;;  %v771_v43 = vpop.f32.mrb[2].mxu0  ;;  %v824_v44 = vpop.f32.mrb[2].mxu1 }
 0x2fd   : > { %843 = vst [vmem:[%s1616_s5 + $0x20] sm:$0xff] %v771_v43  ;;  %845 = vst [vmem:[%s1616_s5 + $0x30] sm:$0xff] %v824_v44  ;;  %v773_v45 = vpop.f32.mrb[3].mxu0  ;;  %v826_v46 = vpop.f32.mrb[3].mxu1 }
 0x2fe   : > { %844 = vst [vmem:[%s1616_s5 + $0x28] sm:$0xff] %v773_v45  ;;  %846 = vst [vmem:[%s1616_s5 + $0x38] sm:$0xff] %v826_v46 }
 0x302   : > { %v777_v47 = vpop.f32.mrb[4].mxu0  ;;  %v830_v48 = vpop.f32.mrb[4].mxu1 }
 0x303   : > { %847 = vst [vmem:[%s1616_s5 + $0x40] sm:$0xff] %v777_v47  ;;  %849 = vst [vmem:[%s1616_s5 + $0x50] sm:$0xff] %v830_v48  ;;  %v779_v6 = vpop.f32.mrb[5].mxu0  ;;  %v832_v49 = vpop.f32.mrb[5].mxu1 }
 0x304   : > { %848 = vst [vmem:[%s1616_s5 + $0x48] sm:$0xff] %v779_v6  ;;  %850 = vst [vmem:[%s1616_s5 + $0x58] sm:$0xff] %v832_v49  ;;  %v781_v50 = vpop.f32.mrb[6].mxu0  ;;  %v834_v51 = vpop.f32.mrb[6].mxu1 }
 0x305   : > { %851 = vst [vmem:[%s1616_s5 + $0x60] sm:$0xff] %v781_v50  ;;  %853 = vst [vmem:[%s1616_s5 + $0x70] sm:$0xff] %v834_v51  ;;  %v783_v52 = vpop.f32.mrb[7].mxu0  ;;  %v836_v53 = vpop.f32.mrb[7].mxu1 }
 0x306   : > { %852 = vst [vmem:[%s1616_s5 + $0x68] sm:$0xff] %v783_v52  ;;  %854 = vst [vmem:[%s1616_s5 + $0x78] sm:$0xff] %v836_v53 }
 0x307   : > { %1288 = shalt.err (!%p1285_p6)
}
 0x308   : > { %s1289_s24 = scalar_lea.hbm %s1796_s22, 2048  ;;  %s1293_s25 = scalar_lea.hbm %s1859_s4, 4096 }
 0x309   : > { %p1290_p9 = scmp.ne.s32.totalorder %s1796_s22, %s1289_s24  ;;  %p1294_p3 = scmp.lt.u32.totalorder %s1796_s22, %s1859_s4 }
 0x30a   : > { %p1295_p12 = scmp.lt.u32.totalorder %s1293_s25, %s1289_s24  ;;  %p1297_p7 = scmp.lt.u32.totalorder %s1289_s24, %s1796_s22 }
 0x30b   : > { %p1291_p13 = pnand %p1290_p9, %p1876_p10 }
 0x30c   : > { %p1296_p4 = por %p1295_p12, %p1294_p3 }
 0x30d   : > { %p1292_p11 = pneg %p1291_p13 }
 0x30e   : > { %p1298_p2 = por %p1297_p7, %p1296_p4 }
 0x310   : > { %p1299_p8 = pnand %p1298_p2, %p1292_p11 }
 0x312   : > { %1302 = shalt.err (!%p1299_p8)
}
 0x313   : > { %s1380_s29 = smov 512   ;;  %s1381_s12 = smov 1024  }
 0x314   : > { %s1382_s14 = smov 32  }
 0x315   : > { %1028 = dma.vmem_to_hbm [thread:$0]  (%p1876_p10), %s1800_s13, 2048, %s1796_s22, %s856_s18, %s1380_s29, %s1381_s12, %s1382_s14  }
 0x316 PF: > { %s887_s8 = sand.u32 1, %s1345_s15   ;;  %p1877_p0 = scmp.ne.s32.totalorder %s1866_s27, 0 }
 0x317   : > { %p1878_p5 = scmp.ge.s32.totalorder %s1365_s20, 2  ;;  %s888_s28 = scalar_lea.sflag [#allocation5], %s887_s8 }
 0x319   : > { %p1042_p1 = pnand %p1878_p5, %p1877_p0 }
 0x31b   : > { %1340 = dma.done.wait (!%p1042_p1), %s888_s28, 2048  }
 0x31c   : > { %1342 = vsyncadd (!%p1042_p1), %s888_s28, 4294965248  ;;  %s19_s20 = sadd.s32 1, %s1365_s20   ;;  %s1879_s15 = smov %s1349_s16 }
 0x31d   : > { %p16_p6 = scmp.ge.s32.totalorder %s19_s20, 4   ;;  %s1880_s16 = smov %s1353_s17 }
 0x31e   : > { %s1881_s17 = smov %s1564_s6  ;;  %s1882_s18 = smov %s1361_s19 }
 0x31f   : > { %s1883_s19 = smov %s1885_s11  ;;  %18 = sbr.rel (!%p16_p6) target bundleno = 6 (0x6), region = 94 }
 0x326   :  { %893 = vsyncpa [#allocation4], 1 }
 0x327   :  { %895 = vsyncpa [#allocation4 + $0x1], 1 }
 0x328   :  { %896 = vsyncpa [#allocation7], 1 }
 0x329   :  { %897 = vsyncpa [#allocation5], 1 }
 0x32a   :  { %899 = vsyncpa [#allocation5 + $0x1], 1 }

</bundles_post_ra>
